<compile_context>
chip_gen: v7x
topology: tpu7x:2x2x1
jax: 0.10.0
libtpu: 0.0.40
codegen_flags: <defaults>
</compile_context>

<pallas_src>
import functools

import jax
import jax.numpy as jnp
from jax.experimental import pallas as pl
from jax.experimental.pallas import tpu as pltpu

_EPS = 1e-5


# ---------------------------------------------------------------------------
# Kernels: one (batch, row-tile) block per grid step.
#   x_ref: (1, C, R, 128)  -- channels leading, pixels on (sublane, lane)
#   w_ref, b_ref: (C, 1, 1)
# ---------------------------------------------------------------------------
def _ln_withbias_kernel(x_ref, w_ref, b_ref, o_ref):
    x = x_ref[0].astype(jnp.float32)                       # (C, R, 128)
    mu = jnp.mean(x, axis=0, keepdims=True)                # (1, R, 128), VPU adds
    xc = x - mu
    var = jnp.mean(xc * xc, axis=0, keepdims=True)         # biased variance
    inv = jax.lax.rsqrt(var + _EPS)                        # EUP
    w = w_ref[...].astype(jnp.float32)                     # (C, 1, 1)
    b = b_ref[...].astype(jnp.float32)
    o_ref[0] = (xc * inv * w + b).astype(o_ref.dtype)


def _ln_biasfree_kernel(x_ref, w_ref, o_ref):
    x = x_ref[0].astype(jnp.float32)                       # (C, R, 128)
    mu = jnp.mean(x, axis=0, keepdims=True)
    # BiasFree normalizes x itself (not x - mu), so a single-pass variance
    # avoids materializing a centered (C, R, 128) temporary.
    var = jnp.mean(x * x, axis=0, keepdims=True) - mu * mu
    var = jnp.maximum(var, 0.0)                            # guard cancellation
    inv = jax.lax.rsqrt(var + _EPS)
    w = w_ref[...].astype(jnp.float32)
    o_ref[0] = (x * inv * w).astype(o_ref.dtype)


# ---------------------------------------------------------------------------
# Tile selection
# ---------------------------------------------------------------------------
def _choose_row_tile(n128, c, itemsize, batch, target_bytes):
    """Pick R (rows of 128 pixels) for a (1, C, R, 128) block.

    Constraints: R is a multiple of 8 that divides n128, or R == n128 (full
    extent, allowed for small planes).  Goals: per-block bytes near
    `target_bytes` so HBM time dominates the ~0.35 us per-step overhead, and
    >= 2 total grid blocks so v7x's two TensorCores both get work.
    """
    if n128 % 8 != 0:
        return n128                                        # small plane: one block
    candidates = [r for r in range(8, n128 + 1, 8) if n128 % r == 0]
    if batch < 2:
        multi = [r for r in candidates if n128 // r >= 2]
        if multi:
            candidates = multi
    r_target = max(8, (target_bytes // (c * 128 * itemsize)) // 8 * 8)
    fits = [r for r in candidates if r <= r_target]
    return max(fits) if fits else min(candidates)


# ---------------------------------------------------------------------------
# Public wrapper: NCHW in, NCHW out (matches LayerNorm.forward)
# ---------------------------------------------------------------------------
def layernorm_nchw(x, weight, bias=None, *, ln_type="WithBias",
                   block_target_bytes=2 << 20):
    b, c, H, W = x.shape
    P = H * W

    # Lane-dense spatial layout: pad H*W up to a multiple of 128 (extra pass
    # only when unaligned), then view as (rows, 128).
    P_pad = pl.cdiv(P, 128) * 128
    x3 = x.reshape(b, c, P)
    if P_pad != P:
        x3 = jnp.pad(x3, ((0, 0), (0, 0), (0, P_pad - P)))
    n128 = P_pad // 128
    x4 = x3.reshape(b, c, n128, 128)

    R = _choose_row_tile(n128, c, jnp.dtype(x.dtype).itemsize, b,
                         block_target_bytes)
    grid = (b, n128 // R)

    x_spec = pl.BlockSpec((1, c, R, 128), lambda i, j: (i, 0, j, 0))
    w_spec = pl.BlockSpec((c, 1, 1), lambda i, j: (0, 0, 0))     # resident
    out_spec = pl.BlockSpec((1, c, R, 128), lambda i, j: (i, 0, j, 0))
    cparams = pltpu.CompilerParams(
        dimension_semantics=("parallel", "parallel"),
        vmem_limit_bytes=32 << 20)

    w2 = weight.reshape(c, 1, 1)
    out_shape = jax.ShapeDtypeStruct((b, c, n128, 128), x.dtype)

    if ln_type == "BiasFree":
        out = pl.pallas_call(
            _ln_biasfree_kernel,
            out_shape=out_shape,
            grid=grid,
            in_specs=[x_spec, w_spec],
            out_specs=out_spec,
            compiler_params=cparams,
        )(x4, w2)
    else:
        assert bias is not None
        b2 = bias.reshape(c, 1, 1)
        out = pl.pallas_call(
            _ln_withbias_kernel,
            out_shape=out_shape,
            grid=grid,
            in_specs=[x_spec, w_spec, w_spec],
            out_specs=out_spec,
            compiler_params=cparams,
        )(x4, w2, b2)

    out = out.reshape(b, c, P_pad)
    if P_pad != P:
        out = out[:, :, :P]
    return out.reshape(b, c, H, W)


# ---------------------------------------------------------------------------
# Pure-JAX reference (mirrors the PyTorch module exactly, via to_3d layout)
# ---------------------------------------------------------------------------
def layernorm_nchw_ref(x, weight, bias=None, *, ln_type="WithBias"):
    b, c, H, W = x.shape
    xt = x.reshape(b, c, H * W).transpose(0, 2, 1)           # (b, hw, c) == to_3d
    mu = jnp.mean(xt, axis=-1, keepdims=True)
    var = jnp.mean((xt - mu) ** 2, axis=-1, keepdims=True)   # unbiased=False
    if ln_type == "BiasFree":
        y = xt / jnp.sqrt(var + _EPS) * weight
    else:
        y = (xt - mu) / jnp.sqrt(var + _EPS) * weight + bias
    return y.transpose(0, 2, 1).reshape(b, c, H, W)          # to_4d


# ---------------------------------------------------------------------------
if __name__ == "__main__":
    key = jax.random.PRNGKey(0)
    keys = jax.random.split(key, 12)

    # Config 1: matches the module driver shape (b=2, dim=4, 16x16).
    B, C, H, W = 2, 4, 16, 16
    x = jax.random.normal(keys[0], (B, C, H, W), dtype=jnp.float32)
    weight = 1.0 + 0.1 * jax.random.normal(keys[1], (C,), jnp.float32)
    bias = 0.1 * jax.random.normal(keys[2], (C,), jnp.float32)

    for ln_type in ("WithBias", "BiasFree"):
        fwd = functools.partial(layernorm_nchw, ln_type=ln_type)
        ref = functools.partial(layernorm_nchw_ref, ln_type=ln_type)
        out = jax.block_until_ready(
            fwd(x, weight, bias if ln_type == "WithBias" else None))
        exp = ref(x, weight, bias if ln_type == "WithBias" else None)
        assert out.shape == (B, C, H, W)
        assert bool(jnp.all(jnp.isfinite(out)))
        assert bool(jnp.allclose(out, exp, atol=1e-4, rtol=1e-4)), \
            f"mismatch vs JAX ref ({ln_type})"

    # Config 2: larger channel count, two batch blocks.
    B2, C2, H2, W2 = 2, 48, 32, 32                            # n128 = 8, R = 8
    x2 = jax.random.normal(keys[3], (B2, C2, H2, W2), dtype=jnp.float32)
    w2 = 1.0 + 0.1 * jax.random.normal(keys[4], (C2,), jnp.float32)
    b2 = 0.1 * jax.random.normal(keys[5], (C2,), jnp.float32)
    out2 = jax.block_until_ready(layernorm_nchw(x2, w2, b2, ln_type="WithBias"))
    exp2 = layernorm_nchw_ref(x2, w2, b2, ln_type="WithBias")
    assert bool(jnp.allclose(out2, exp2, atol=1e-4, rtol=1e-4)), \
        "mismatch vs JAX ref (config 2)"

    # Config 3: batch=1, multi row-tile grid (exercises pipelining + >=2 blocks).
    B3, C3, H3, W3 = 1, 8, 64, 64                             # n128 = 32 -> R = 16
    x3 = jax.random.normal(keys[6], (B3, C3, H3, W3), dtype=jnp.float32)
    w3 = 1.0 + 0.1 * jax.random.normal(keys[7], (C3,), jnp.float32)
    b3 = 0.1 * jax.random.normal(keys[8], (C3,), jnp.float32)
    out3 = jax.block_until_ready(layernorm_nchw(x3, w3, b3, ln_type="WithBias"))
    exp3 = layernorm_nchw_ref(x3, w3, b3, ln_type="WithBias")
    assert bool(jnp.allclose(out3, exp3, atol=1e-4, rtol=1e-4)), \
        "mismatch vs JAX ref (config 3)"

    # Config 4: odd spatial size (H*W not a multiple of 128) -> padded path.
    B4, C4, H4, W4 = 1, 6, 17, 19
    x4 = jax.random.normal(keys[9], (B4, C4, H4, W4), dtype=jnp.float32)
    w4 = 1.0 + 0.1 * jax.random.normal(keys[10], (C4,), jnp.float32)
    out4 = jax.block_until_ready(layernorm_nchw(x4, w4, ln_type="BiasFree"))
    exp4 = layernorm_nchw_ref(x4, w4, ln_type="BiasFree")
    assert bool(jnp.allclose(out4, exp4, atol=1e-4, rtol=1e-4)), \
        "mismatch vs JAX ref (padded config)"

    print("KERNEL_OK")
</pallas_src>

<mosaic_0001>
module attributes {stable_mosaic.version = 11 : i64} {
  func.func @_ln_withbias_kernel(%arg0: i32, %arg1: i32, %arg2: memref<1x4x2x128xf32, #tpu.memory_space<vmem>>, %arg3: memref<4x1x1xf32, #tpu.memory_space<vmem>>, %arg4: memref<4x1x1xf32, #tpu.memory_space<vmem>>, %arg5: memref<1x4x2x128xf32, #tpu.memory_space<vmem>>) attributes {dimension_semantics = [#tpu.dimension_semantics<parallel>, #tpu.dimension_semantics<parallel>], iteration_bounds = array<i64: 2, 1>, scalar_prefetch = 0 : i64, scratch_operands = 0 : i64, tpu.core_type = #tpu.core_type<tc>, window_params = [{transform_indices = @transform_0, window_bounds = array<i64: 1, 4, 2, 128>}, {pipeline_mode = #tpu.pipeline_mode<synchronous>, transform_indices = @transform_1, window_bounds = array<i64: 4, 1, 1>}, {pipeline_mode = #tpu.pipeline_mode<synchronous>, transform_indices = @transform_2, window_bounds = array<i64: 4, 1, 1>}, {transform_indices = @transform_3, window_bounds = array<i64: 1, 4, 2, 128>}]} {
    %c0 = arith.constant 0 : index
    %c0_0 = arith.constant 0 : index
    %c0_1 = arith.constant 0 : index
    %c0_2 = arith.constant 0 : index
    %0 = vector.load %arg2[%c0, %c0_0, %c0_1, %c0_2] : memref<1x4x2x128xf32, #tpu.memory_space<vmem>>, vector<1x4x2x128xf32>
    %1 = vector.shape_cast %0 : vector<1x4x2x128xf32> to vector<4x2x128xf32>
    %cst = arith.constant dense<0.000000e+00> : vector<2x128xf32>
    %2 = vector.multi_reduction <add>, %1, %cst [0] : vector<4x2x128xf32> to vector<2x128xf32>
    %3 = vector.shape_cast %2 : vector<2x128xf32> to vector<1x2x128xf32>
    %cst_3 = arith.constant 4.000000e+00 : f32
    %4 = vector.broadcast %cst_3 : f32 to vector<1x2x128xf32>
    %5 = arith.divf %3, %4 : vector<1x2x128xf32>
    %6 = vector.broadcast %5 : vector<1x2x128xf32> to vector<4x2x128xf32>
    %7 = arith.subf %1, %6 : vector<4x2x128xf32>
    %8 = arith.mulf %7, %7 : vector<4x2x128xf32>
    %cst_4 = arith.constant dense<0.000000e+00> : vector<2x128xf32>
    %9 = vector.multi_reduction <add>, %8, %cst_4 [0] : vector<4x2x128xf32> to vector<2x128xf32>
    %10 = vector.shape_cast %9 : vector<2x128xf32> to vector<1x2x128xf32>
    %cst_5 = arith.constant 4.000000e+00 : f32
    %11 = vector.broadcast %cst_5 : f32 to vector<1x2x128xf32>
    %12 = arith.divf %10, %11 : vector<1x2x128xf32>
    %cst_6 = arith.constant 9.99999974E-6 : f32
    %13 = vector.broadcast %cst_6 : f32 to vector<1x2x128xf32>
    %14 = arith.addf %12, %13 : vector<1x2x128xf32>
    %15 = math.rsqrt %14 : vector<1x2x128xf32>
    %c0_7 = arith.constant 0 : index
    %c0_8 = arith.constant 0 : index
    %c0_9 = arith.constant 0 : index
    %16 = vector.load %arg3[%c0_7, %c0_8, %c0_9] : memref<4x1x1xf32, #tpu.memory_space<vmem>>, vector<4x1x1xf32>
    %c0_10 = arith.constant 0 : index
    %c0_11 = arith.constant 0 : index
    %c0_12 = arith.constant 0 : index
    %17 = vector.load %arg4[%c0_10, %c0_11, %c0_12] : memref<4x1x1xf32, #tpu.memory_space<vmem>>, vector<4x1x1xf32>
    %18 = vector.broadcast %15 : vector<1x2x128xf32> to vector<4x2x128xf32>
    %19 = arith.mulf %7, %18 : vector<4x2x128xf32>
    %20 = vector.broadcast %16 : vector<4x1x1xf32> to vector<4x2x128xf32>
    %21 = arith.mulf %19, %20 : vector<4x2x128xf32>
    %22 = vector.broadcast %17 : vector<4x1x1xf32> to vector<4x2x128xf32>
    %23 = arith.addf %21, %22 : vector<4x2x128xf32>
    %c0_13 = arith.constant 0 : index
    %c0_14 = arith.constant 0 : index
    %c0_15 = arith.constant 0 : index
    %c0_16 = arith.constant 0 : index
    %24 = vector.load %arg5[%c0_13, %c0_14, %c0_15, %c0_16] : memref<1x4x2x128xf32, #tpu.memory_space<vmem>>, vector<1x4x2x128xf32>
    %25 = vector.shape_cast %24 : vector<1x4x2x128xf32> to vector<4x2x128xf32>
    %26 = vector.shape_cast %23 : vector<4x2x128xf32> to vector<1x4x2x128xf32>
    tpu.vector_store %arg5[%c0_13, %c0_14, %c0_15, %c0_16], %26 {strides = array<i32>} : memref<1x4x2x128xf32, #tpu.memory_space<vmem>>, vector<1x4x2x128xf32>,
    return
  }
  func.func @transform_0(%arg0: i32, %arg1: i32) -> (i32, i32, i32, i32) {
    %c0_i32 = arith.constant 0 : i32
    %c0_i32_0 = arith.constant 0 : i32
    %c0_i32_1 = arith.constant 0 : i32
    return %arg0, %c0_i32, %arg1, %c0_i32_0 : i32, i32, i32, i32
  }
  func.func @transform_1(%arg0: i32, %arg1: i32) -> (i32, i32, i32) {
    %c0_i32 = arith.constant 0 : i32
    %c0_i32_0 = arith.constant 0 : i32
    %c0_i32_1 = arith.constant 0 : i32
    %c0_i32_2 = arith.constant 0 : i32
    return %c0_i32, %c0_i32_0, %c0_i32_1 : i32, i32, i32
  }
  func.func @transform_2(%arg0: i32, %arg1: i32) -> (i32, i32, i32) {
    %c0_i32 = arith.constant 0 : i32
    %c0_i32_0 = arith.constant 0 : i32
    %c0_i32_1 = arith.constant 0 : i32
    %c0_i32_2 = arith.constant 0 : i32
    return %c0_i32, %c0_i32_0, %c0_i32_1 : i32, i32, i32
  }
  func.func @transform_3(%arg0: i32, %arg1: i32) -> (i32, i32, i32, i32) {
    %c0_i32 = arith.constant 0 : i32
    %c0_i32_0 = arith.constant 0 : i32
    %c0_i32_1 = arith.constant 0 : i32
    return %arg0, %c0_i32, %arg1, %c0_i32_0 : i32, i32, i32, i32
  }
}

</mosaic_0001>

<bundles_post_ra>
// kernel: tpu_custom_call.1
= control target key start
LH: loop header
LB: loop body
LE: loop exit
PB: predicated region body
PF: predicated region fallthrough
CT: control target
= control target key end

     0   :  { %8 = vsyncpa [#allocation3], 0  ;;  %s882_s0 = inlined_call_operand.hbm [shape: f32[2,4,2,128], index: 0, kind: input, shape index: {}]   ;;  %s883_s1 = inlined_call_operand.vmem [shape: f32[4,1,1], index: 1, kind: input, shape index: {}]   ;;  %s884_s2 = inlined_call_operand.vmem [shape: f32[4,1,1], index: 2, kind: input, shape index: {}]   ;;  %s885_s3 = inlined_call_operand.hbm [shape: f32[2,4,2,128], index: 3, kind: output, shape index: {}]  }
   0x1   :  { %10 = vsyncpa [#allocation3 + $0x1], 0 }
   0x2   :  { %11 = vsyncpa [#allocation4], 0 }
   0x3   :  { %13 = vsyncpa [#allocation4 + $0x1], 0  ;;  %s671_s12 = smov 0   ;;  %s673_s13 = smov 0  }
   0x4   :  { %s675_s14 = smov 0   ;;  %s677_s15 = smov 0  }
   0x5   :  { %s679_s16 = smov 0   ;;  %s681_s17 = smov 0  }
   0x6 LB: > { %s434_s18 = sadd.s32 4294967295, %s642_s17   ;;  %s435_s19 = sadd.s32 4294967294, %s642_s17   ;;  %s642_s17 = sphi %s681_s17, %s19_s17   ;;  %s638_s16 = sphi %s679_s16, %s900_s16   ;;  %s634_s15 = sphi %s677_s15, %s899_s15   ;;  %s630_s14 = sphi %s675_s14, %s898_s14   ;;  %s626_s13 = sphi %s673_s13, %s897_s13   ;;  %s622_s12 = sphi %s671_s12, %s896_s12  }
   0x7   : > { %s31_s20 = sadd.s32 1, %s638_s16  ;;  %s40_s21 = sadd.s32 1, %s630_s14 }
   0x8   : > { %p33_p0 = scmp.ge.s32.totalorder %s31_s20, 2  ;;  %p47_p1 = scmp.ne.s32.totalorder %s630_s14, %s626_s13 }
   0x9   : > { %p48_p2 = scmp.eq.s32.totalorder %s642_s17, 0  ;;  %p53_p3 = scmp.ne.s32.totalorder %s626_s13, %s622_s12 }
   0xa   : > { %s902_s20 = smov (%p33_p0, %s31_s20), 0  ;;  %p54_p5 = scmp.eq.s32.totalorder %s434_s18, 0 }
   0xb   : > { %p712_p4 = por %p48_p2, %p47_p1  ;;  %s35_s23 = ssub.s32 %s638_s16, %s902_s20 }
   0xc   : > { %p121_p6 = scmp.eq.s32.totalorder %s434_s18, 1  ;;  %p38_p7 = scmp.eq.s32.totalorder %s35_s23, 0 }
   0xd   : > { %p718_p8 = por %p54_p5, %p53_p3  ;;  %p127_p10 = scmp.eq.s32.totalorder %s435_s19, 1 }
   0xe   : > { %p722_p9 = por %p121_p6, %p47_p1  ;;  %p471_p13 = scmp.lt.s32.totalorder %s642_s17, 2 }
   0xf   : > { %s727_s26 = scalar_select %p38_p7, %s630_s14, %s40_s21  }
  0x10   : > { %s889_s25 = scalar_select %p722_p9, 1, 0 }
  0x11   : > { %p729_p11 = por %p127_p10, %p53_p3  ;;  %s153_s28 = sand.u32 1, %s630_s14  }
  0x12   : > { %s438_s29 = sshll.u32 %s153_s28, 3  ;;  %s457_s30 = sshll.u32 %s638_s16, 7 }
  0x13   : > { %s890_s27 = scalar_select %p729_p11, 1, 0 }
  0x14   : > { %s740_s6 = scalar_lea.hbm %s882_s0, %s457_s30  ;;  %s157_s7 = scalar_lea.vmem [#allocation2], %s438_s29 }
  0x15   : > { %s165_s8 = sshll.u32 %s157_s7, 4  ;;  %p746_p0 = pnand %p471_p13, %p712_p4  ;;  %s742_s8 = int_to_ptr.vmem [resolvable:$true] %s165_s8 }
  0x16   : > { %s751_s10 = scalar_lea.sflag [#allocation3], %s153_s28  ;;  %s530_s11 = scalar_lea.hbm %s740_s6, 128 }
  0x17   : > { %p531_p2 = scmp.ne.s32.totalorder %s740_s6, %s530_s11  ;;  %p532_p3 = pneg %p746_p0 }
  0x18   : > { %s535_s21 = scalar_lea.hbm %s882_s0, 256  ;;  %p536_p4 = scmp.lt.u32.totalorder %s740_s6, %s882_s0 }
  0x19   : > { %p533_p5 = pnand %p532_p3, %p531_p2  ;;  %p537_p7 = scmp.lt.u32.totalorder %s535_s21, %s530_s11 }
  0x1a   : > { %p539_p13 = scmp.lt.u32.totalorder %s530_s11, %s740_s6 }
  0x1b   : > { %p534_p6 = pneg %p533_p5  ;;  %p538_p10 = por %p537_p7, %p536_p4 }
  0x1d   : > { %p540_p12 = por %p539_p13, %p538_p10 }
  0x1f   : > { %p541_p1 = pnand %p540_p12, %p534_p6 }
  0x21   : > { %544 = shalt.err (!%p541_p1)
}
  0x22   : > { %s545_s28 = scalar_lea.vmem %s742_s8, 128  ;;  %s644_s29 = smov [#allocation2]  }
  0x23   : > { %p546_p2 = scmp.ne.s32.totalorder %s742_s8, %s545_s28  ;;  %s550_s30 = sshll.u32 %s644_s29, 4  ;;  %s551_s30 = int_to_ptr.vmem [resolvable:$false] %s550_s30 }
  0x24   : > { %s552_s4 = scalar_lea.vmem %s551_s30, 256  ;;  %p553_p9 = scmp.lt.s32.totalorder %s742_s8, %s551_s30 }
  0x25   : > { %p548_p5 = pnand %p546_p2, %p532_p3  ;;  %p554_p4 = scmp.lt.s32.totalorder %s552_s4, %s545_s28 }
  0x27   : > { %p549_p11 = pneg %p548_p5  ;;  %p555_p7 = por %p554_p4, %p553_p9 }
  0x29   : > { %p556_p10 = pnand %p555_p7, %p549_p11 }
  0x2b   : > { %559 = shalt.err (!%p556_p10)
}
  0x2c   : > { %s645_s5 = smov 32   ;;  %s646_s7 = smov 2  }
  0x2d   : > { %466 = dma.hbm_to_vmem [thread:$0]  (!%p746_p0), %s740_s6, 128, %s742_s8, %s751_s10, %s645_s5, %s645_s5, %s646_s7  }
  0x2e   : > { %p173_p12 = scmp.lt.s32.totalorder %s642_s17, 3  ;;  %p892_p1 = scmp.ge.s32.totalorder %s642_s17, 1 }
  0x30   : > { %p174_p3 = pnand %p892_p1, %p173_p12 }
  0x31   : > { %s783_s11 = sand.u32 (!%p174_p3), 1, %s626_s13  }
  0x32   : > { %177 = sbr.rel (%p174_p3) target bundleno = 217 (0xd9), region = 32  ;;  %s442_s18 = sshll.u32 (!%p174_p3), %s783_s11, 3 }
  0x33   : > { %s180_s19 = scalar_lea.sflag (!%p174_p3), [#allocation3], %s783_s11  ;;  %s183_s21 = scalar_lea.vmem (!%p174_p3), [#allocation2], %s442_s18 }
  0x39   : > { %613 = dma.done.wait (%p718_p8), %s180_s19, 128  }
  0x3a   : > { %615 = vsyncadd (%p718_p8), %s180_s19, 4294967168  ;;  %v647_v0 = vmov 0   ;;  %v446_v1 = vld [vmem:[%s883_s1 + $0x2] ss:$0 sm:$0xff]  ;;  %v444_v2 = vld [vmem:[%s883_s1] ss:$0 sm:$0xff] }
  0x3b   : > { %527 = vset.pattern.permute.xlu1 %v647_v0  ;;  %526 = vset.pattern.permute.xlu0 %v647_v0  ;;  %v447_v3 = vld [vmem:[%s883_s1 + $0x3] ss:$0 sm:$0xff]  ;;  %v445_v4 = vld [vmem:[%s883_s1 + $0x1] ss:$0 sm:$0xff]  ;;  %v448_v6 = vld [vmem:[%s884_s2] ss:$0 sm:$0xff] }
  0x3c   : > { %279 = vperm.xlu1 %527, %v446_v1   ;;  %271 = vperm.xlu0 %526, %v444_v2   ;;  %v449_v5 = vld [vmem:[%s884_s2 + $0x1] ss:$0 sm:$0xff]  ;;  %v451_v7 = vld [vmem:[%s884_s2 + $0x3] ss:$0 sm:$0xff]  ;;  %v450_v8 = vld [vmem:[%s884_s2 + $0x2] ss:$0 sm:$0xff] }
  0x3d   : > { %vm210_vm0 = vcmask 1041408   ;;  %v206_v9 = vld [vmem:[%s183_s21] sm:$0x3]  ;;  %v207_v10 = vld [vmem:[%s183_s21 + $0x2] sm:$0x3]  ;;  %s458_s10 = sshll.u32 %s634_s15, 7 }
  0x3e   : > { %v211_v11 = vsel %vm210_vm0, %v206_v9, 0.0  ;;  %v212_v12 = vsel %vm210_vm0, %v207_v10, 0.0  ;;  %v208_v13 = vld [vmem:[%s183_s21 + $0x4] sm:$0x3]  ;;  %v209_v16 = vld [vmem:[%s183_s21 + $0x6] sm:$0x3]  ;;  %s833_s23 = scalar_lea.hbm %s885_s3, %s458_s10 }
  0x3f   : > { %v213_v14 = vadd.f32 %v212_v12, %v211_v11  ;;  %v214_v15 = vsel %vm210_vm0, %v208_v13, 0.0  ;;  %v216_v18 = vsel %vm210_vm0, %v209_v16, 0.0  ;;  %s205_s21 = scalar_lea.vmem [#allocation5], %s442_s18  ;;  %s335_s15 = scalar_lea.sflag [#allocation4], %s783_s11 }
  0x40   : > { %283 = vperm.xlu1 %527, %v447_v3   ;;  %275 = vperm.xlu0 %526, %v445_v4   ;;  %s349_s9 = sshll.u32 %s205_s21, 4  ;;  %p893_p9 = scmp.ne.s32.totalorder %s889_s25, 0  ;;  %s828_s9 = int_to_ptr.vmem [resolvable:$true] %s349_s9 }
  0x41   : > { %v215_v17 = vadd.f32 %v214_v15, %v213_v14  ;;  %s560_s28 = scalar_lea.vmem %s828_s9, 128  ;;  %s648_s24 = smov [#allocation5]  }
  0x42   : > { %p561_p8 = scmp.ne.s32.totalorder %s828_s9, %s560_s28  ;;  %s564_s29 = sshll.u32 %s648_s24, 4  ;;  %s565_s29 = int_to_ptr.vmem [resolvable:$false] %s564_s29 }
  0x43   : > { %v217_v19 = vadd.f32 %v216_v18, %v215_v17  ;;  %s566_s30 = scalar_lea.vmem %s565_s29, 256  ;;  %p567_p6 = scmp.lt.s32.totalorder %s828_s9, %s565_s29 }
  0x44   : > { %315 = vperm.xlu1 %527, %v449_v5   ;;  %311 = vperm.xlu0 %526, %v448_v6   ;;  %p562_p11 = pnand %p561_p8, %p893_p9  ;;  %p568_p13 = scmp.lt.s32.totalorder %s566_s30, %s560_s28 }
  0x45   : > { %v219_v20 = vmul.f32 0.25, %v217_v19 }
  0x46   : > { %p563_p0 = pneg %p562_p11  ;;  %p569_p2 = por %p568_p13, %p567_p6 }
  0x47   : > { %v220_v21 = vsub.f32 %v206_v9, %v219_v20  ;;  %v221_v22 = vsub.f32 %v207_v10, %v219_v20  ;;  %v222_v23 = vsub.f32 %v208_v13, %v219_v20  ;;  %v223_v26 = vsub.f32 %v209_v16, %v219_v20 }
  0x48   : > { %323 = vperm.xlu1 %527, %v451_v7   ;;  %319 = vperm.xlu0 %526, %v450_v8   ;;  %p570_p5 = pnand %p569_p2, %p563_p0 }
  0x49   : > { %v224_v24 = vmul.f32 %v220_v21, %v220_v21  ;;  %v225_v25 = vmul.f32 %v221_v22, %v221_v22  ;;  %v226_v27 = vmul.f32 %v222_v23, %v222_v23  ;;  %v227_v31 = vmul.f32 %v223_v26, %v223_v26 }
  0x4b   : > { %v228_v28 = vsel %vm210_vm0, %v224_v24, 0.0  ;;  %v229_v29 = vsel %vm210_vm0, %v225_v25, 0.0  ;;  %v231_v32 = vsel %vm210_vm0, %v226_v27, 0.0  ;;  %v233_v34 = vsel %vm210_vm0, %v227_v31, 0.0 }
  0x4c   : > { %v230_v30 = vadd.f32 %v229_v29, %v228_v28 }
  0x4e   : > { %v232_v33 = vadd.f32 %v231_v32, %v230_v30 }
  0x50   : > { %v234_v35 = vadd.f32 %v233_v34, %v232_v33 }
  0x52   : > { %v235_v36 = vmul.f32 0.25, %v234_v35 }
  0x54   : > { %v236_v37 = vadd.f32 1e-05, %v235_v36 }
  0x56   : > { %528 = vrsqrt.f32 %v236_v37 }
  0x60   : > { %v529_v38 = vpop.eup %528 }
  0x61   : > { %v246_v41 = vmul.f32 %v529_v38, %v220_v21  ;;  %v247_v42 = vmul.f32 %v529_v38, %v221_v22  ;;  %v248_v45 = vmul.f32 %v529_v38, %v222_v23  ;;  %v249_v47 = vmul.f32 %v529_v38, %v223_v26 }
  0xbb   : > { %v280_v39 = vpop.permute.xlu1 %279  ;;  %v272_v40 = vpop.permute.xlu0 %271 }
  0xbc   : > { %v286_v46 = vmul.f32 %v272_v40, %v246_v41  ;;  %v288_v53 = vmul.f32 %v280_v39, %v248_v45 }
  0xbf   : > { %v284_v43 = vpop.permute.xlu1 %283  ;;  %v276_v44 = vpop.permute.xlu0 %275 }
  0xc0   : > { %v287_v48 = vmul.f32 %v276_v44, %v247_v42  ;;  %v289_v54 = vmul.f32 %v284_v43, %v249_v47 }
  0xc3   : > { %v316_v49 = vpop.permute.xlu1 %315  ;;  %v312_v50 = vpop.permute.xlu0 %311 }
  0xc4   : > { %v327_v51 = vadd.f32 %v316_v49, %v287_v48  ;;  %v326_v52 = vadd.f32 %v312_v50, %v286_v46 }
  0xc6   : > { %331 = vst [vmem:[%s205_s21 + $0x2] sm:$0x3] %v327_v51  ;;  %330 = vst [vmem:[%s205_s21] sm:$0x3] %v326_v52 }
  0xc7   : > { %v324_v55 = vpop.permute.xlu1 %323  ;;  %v320_v56 = vpop.permute.xlu0 %319 }
  0xc8   : > { %v329_v57 = vadd.f32 %v324_v55, %v289_v54  ;;  %v328_v58 = vadd.f32 %v320_v56, %v288_v53 }
  0xca   : > { %333 = vst [vmem:[%s205_s21 + $0x6] sm:$0x3] %v329_v57  ;;  %332 = vst [vmem:[%s205_s21 + $0x4] sm:$0x3] %v328_v58 }
  0xcb   : > { %573 = shalt.err (!%p570_p5)
}
  0xcc   : > { %s574_s4 = scalar_lea.hbm %s833_s23, 128  ;;  %s578_s19 = scalar_lea.hbm %s885_s3, 256 }
  0xcd   : > { %p575_p4 = scmp.ne.s32.totalorder %s833_s23, %s574_s4  ;;  %p579_p12 = scmp.lt.u32.totalorder %s833_s23, %s885_s3 }
  0xce   : > { %p580_p1 = scmp.lt.u32.totalorder %s578_s19, %s574_s4  ;;  %p582_p8 = scmp.lt.u32.totalorder %s574_s4, %s833_s23 }
  0xcf   : > { %p576_p7 = pnand %p575_p4, %p893_p9 }
  0xd0   : > { %p581_p3 = por %p580_p1, %p579_p12 }
  0xd1   : > { %p577_p10 = pneg %p576_p7 }
  0xd2   : > { %p583_p11 = por %p582_p8, %p581_p3 }
  0xd4   : > { %p584_p0 = pnand %p583_p11, %p577_p10 }
  0xd6   : > { %587 = shalt.err (!%p584_p0)
}
  0xd7   : > { %s649_s21 = smov 32   ;;  %s650_s10 = smov 2  }
  0xd8   : > { %461 = dma.vmem_to_hbm [thread:$0]  (%p893_p9), %s828_s9, 128, %s833_s23, %s335_s15, %s649_s21, %s649_s21, %s650_s10  }
  0xd9 PF: > { %s364_s18 = sand.u32 1, %s622_s12   ;;  %p894_p6 = scmp.ne.s32.totalorder %s890_s27, 0 }
  0xda   : > { %p895_p13 = scmp.ge.s32.totalorder %s642_s17, 2  ;;  %s365_s22 = scalar_lea.sflag [#allocation4], %s364_s18 }
  0xdc   : > { %p468_p2 = pnand %p895_p13, %p894_p6 }
  0xde   : > { %617 = dma.done.wait (!%p468_p2), %s365_s22, 128  }
  0xdf   : > { %619 = vsyncadd (!%p468_p2), %s365_s22, 4294967168  ;;  %s19_s17 = sadd.s32 1, %s642_s17   ;;  %s896_s12 = smov %s626_s13 }
  0xe0   : > { %p16_p5 = scmp.ge.s32.totalorder %s19_s17, 4   ;;  %s897_s13 = smov %s630_s14 }
  0xe1   : > { %s898_s14 = smov %s727_s26  ;;  %s899_s15 = smov %s638_s16 }
  0xe2   : > { %s900_s16 = smov %s902_s20  ;;  %18 = sbr.rel (!%p16_p5) target bundleno = 6 (0x6), region = 77 }
  0xe9   :  { %370 = vsyncpa [#allocation3], 1 }
  0xea   :  { %372 = vsyncpa [#allocation3 + $0x1], 1 }
  0xeb   :  { %373 = vsyncpa [#allocation4], 1 }
  0xec   :  { %375 = vsyncpa [#allocation4 + $0x1], 1 }

</bundles_post_ra>
